<compile_context>
chip_gen: v7x
topology: tpu7x:2x2x1
jax: 0.10.0
libtpu: 0.0.40
codegen_flags: <defaults>
</compile_context>

<pallas_src>
import jax
import jax.numpy as jnp
from jax.experimental import pallas as pl
from jax.experimental.pallas import tpu as pltpu


def _conv1x1_bn_relu_kernel(x_ref, w_ref, bias_ref, o_ref):
    # x_ref:    (1, Cin, TILE_HW)  activation tile (bf16 by default)
    # w_ref:    (Cout, Cin)        BN-scale-folded 1x1 conv weight
    # bias_ref: (Cout, 1)          folded BN bias (f32)
    # o_ref:    (1, Cout, TILE_HW) output tile (NCHW layout, lane-dense last dim)
    y = jnp.dot(w_ref[...], x_ref[0],
                preferred_element_type=jnp.float32)        # MXU, f32 accumulation
    y = y + bias_ref[...]                                  # (Cout,1) broadcast over lanes
    o_ref[0] = jnp.maximum(y, 0.0).astype(o_ref.dtype)


def _pick_hw_tile(hw, cap):
    """Pick the spatial (lane) tile: a divisor of hw that is a multiple of 128
    (or hw itself when hw <= cap), falling back to padding only if needed."""
    cap = max(128, (cap // 128) * 128)
    if hw <= cap:
        return hw, hw                      # single full block, no padding
    for t in range(cap, 127, -128):        # prefer lane-dense divisors
        if hw % t == 0:
            return t, hw
    # No multiple-of-128 divisor: pad H*W up to a multiple of `cap`.
    return cap, ((hw + cap - 1) // cap) * cap


def conv1x1_bn_relu(x_nchw, weight, gamma, beta, running_mean, running_var,
                    eps=1e-5, tile_hw=512, compute_dtype=jnp.bfloat16):
    """x_nchw: (N, Cin, H, W); weight: (Cout, Cin) (the 1x1 conv kernel squeezed)."""
    N, Cin, H, W = x_nchw.shape
    Cout = weight.shape[0]
    HW = H * W
    out_dtype = x_nchw.dtype

    # Fold eval-mode BN into an affine, then fold the scale into the conv weight.
    scale = (gamma.astype(jnp.float32)
             / jnp.sqrt(running_var.astype(jnp.float32) + eps))           # (Cout,)
    bias = (beta.astype(jnp.float32)
            - running_mean.astype(jnp.float32) * scale).reshape(Cout, 1)  # (Cout,1) f32
    w_folded = (weight.astype(jnp.float32) * scale[:, None]).astype(compute_dtype)

    # NCHW -> (N, Cin, H*W): a free reshape, no transpose / HBM round trip.
    x = x_nchw.reshape(N, Cin, HW).astype(compute_dtype)

    tile, hw_pad = _pick_hw_tile(HW, tile_hw)
    if hw_pad != HW:
        # TODO(synk): a masked store for the ragged last block would avoid this pad copy.
        x = jnp.pad(x, ((0, 0), (0, 0), (0, hw_pad - HW)))

    grid = (N, hw_pad // tile)

    # Note: the full-weight BlockSpec has a constant index_map, so it is fetched
    # once; for very large Cin*Cout on v7x consider pipeline_mode=pl.Buffered(1)
    # and an explicit vmem_limit_bytes budget.
    out = pl.pallas_call(
        _conv1x1_bn_relu_kernel,
        out_shape=jax.ShapeDtypeStruct((N, Cout, hw_pad), out_dtype),
        grid_spec=pltpu.PrefetchScalarGridSpec(
            num_scalar_prefetch=0,
            grid=grid,
            in_specs=[
                pl.BlockSpec((1, Cin, tile), lambda n, j: (n, 0, j)),
                pl.BlockSpec((Cout, Cin), lambda n, j: (0, 0)),
                pl.BlockSpec((Cout, 1), lambda n, j: (0, 0)),
            ],
            out_specs=pl.BlockSpec((1, Cout, tile), lambda n, j: (n, 0, j)),
        ),
        compiler_params=pltpu.CompilerParams(
            dimension_semantics=("parallel", "parallel")),
    )(x, w_folded, bias)

    if hw_pad != HW:
        out = out[:, :, :HW]
    return out.reshape(N, Cout, H, W)


def _reference(x_nchw, weight, gamma, beta, mean, var, eps=1e-5,
               compute_dtype=jnp.float32):
    # Plain-JAX reference of Conv1x1 + eval-mode BN + ReLU in NCHW, with the same
    # optional bf16 rounding of the MXU operands as the kernel.
    scale = gamma / jnp.sqrt(var + eps)
    bias = beta - mean * scale
    w_folded = (weight * scale[:, None]).astype(compute_dtype).astype(jnp.float32)
    xq = x_nchw.astype(compute_dtype).astype(jnp.float32)
    y = jnp.einsum('oc,nchw->nohw', w_folded, xq)
    y = y + bias[None, :, None, None]
    return jnp.maximum(y, 0.0)


if __name__ == "__main__":
    key = jax.random.PRNGKey(0)
    k_x, k_w, k_g, k_b, k_m, k_v = jax.random.split(key, 6)

    N, Cin, Cout, H, W = 2, 4, 8, 16, 16

    x = jax.random.normal(k_x, (N, Cin, H, W), dtype=jnp.float32)
    # Conv2d(in_planes, out_planes, kernel_size=1, bias=False) -> weight (Cout, Cin, 1, 1)
    weight = jax.random.normal(k_w, (Cout, Cin), dtype=jnp.float32) * 0.5
    gamma = 1.0 + 0.1 * jax.random.normal(k_g, (Cout,), dtype=jnp.float32)
    beta = 0.1 * jax.random.normal(k_b, (Cout,), dtype=jnp.float32)
    running_mean = 0.1 * jax.random.normal(k_m, (Cout,), dtype=jnp.float32)
    running_var = jnp.abs(1.0 + 0.1 * jax.random.normal(k_v, (Cout,), dtype=jnp.float32))

    out = conv1x1_bn_relu(x, weight, gamma, beta, running_mean, running_var)
    out = jax.block_until_ready(out)

    assert out.shape == (N, Cout, H, W)

    # Tight check against a reference that applies the same bf16 rounding to the
    # matmul operands (kernel accumulates in f32, so this should match closely).
    ref_bf16 = _reference(x, weight, gamma, beta, running_mean, running_var,
                          compute_dtype=jnp.bfloat16)
    assert jnp.max(jnp.abs(out - ref_bf16)) < 1e-3

    # Loose sanity check against the pure-f32 reference (bounds the bf16 cast error).
    ref_f32 = _reference(x, weight, gamma, beta, running_mean, running_var,
                         compute_dtype=jnp.float32)
    assert jnp.max(jnp.abs(out - ref_f32)) < 5e-2

    print("KERNEL_OK")
</pallas_src>

<mosaic_0001>
module attributes {stable_mosaic.version = 11 : i64} {
  func.func @_conv1x1_bn_relu_kernel(%arg0: i32, %arg1: i32, %arg2: memref<1x4x256xbf16, #tpu.memory_space<vmem>>, %arg3: memref<8x4xbf16, #tpu.memory_space<vmem>>, %arg4: memref<8x1xf32, #tpu.memory_space<vmem>>, %arg5: memref<1x8x256xf32, #tpu.memory_space<vmem>>) attributes {dimension_semantics = [#tpu.dimension_semantics<parallel>, #tpu.dimension_semantics<parallel>], iteration_bounds = array<i64: 2, 1>, scalar_prefetch = 0 : i64, scratch_operands = 0 : i64, tpu.core_type = #tpu.core_type<tc>, window_params = [{transform_indices = @transform_0, window_bounds = array<i64: 1, 4, 256>}, {pipeline_mode = #tpu.pipeline_mode<synchronous>, transform_indices = @transform_1, window_bounds = array<i64: 8, 4>}, {pipeline_mode = #tpu.pipeline_mode<synchronous>, transform_indices = @transform_2, window_bounds = array<i64: 8, 1>}, {transform_indices = @transform_3, window_bounds = array<i64: 1, 8, 256>}]} {
    %c0 = arith.constant 0 : index
    %c0_0 = arith.constant 0 : index
    %0 = vector.load %arg3[%c0, %c0_0] : memref<8x4xbf16, #tpu.memory_space<vmem>>, vector<8x4xbf16>
    %c0_1 = arith.constant 0 : index
    %c0_2 = arith.constant 0 : index
    %c0_3 = arith.constant 0 : index
    %1 = vector.load %arg2[%c0_1, %c0_2, %c0_3] : memref<1x4x256xbf16, #tpu.memory_space<vmem>>, vector<1x4x256xbf16>
    %2 = vector.shape_cast %1 : vector<1x4x256xbf16> to vector<4x256xbf16>
    %cst = arith.constant dense<0.000000e+00> : vector<8x256xf32>
    %3 = tpu.matmul %0, %2, %cst {dimension_numbers = #tpu.dot_dimension_numbers<[1], [0], [0], [1], [0, 0, 1, 1], [], []>} : vector<8x4xbf16>, vector<4x256xbf16>, vector<8x256xf32> -> vector<8x256xf32>
    %c0_4 = arith.constant 0 : index
    %c0_5 = arith.constant 0 : index
    %4 = vector.load %arg4[%c0_4, %c0_5] : memref<8x1xf32, #tpu.memory_space<vmem>>, vector<8x1xf32>
    %5 = vector.broadcast %4 : vector<8x1xf32> to vector<8x256xf32>
    %6 = arith.addf %3, %5 : vector<8x256xf32>
    %cst_6 = arith.constant 0.000000e+00 : f32
    %7 = vector.broadcast %cst_6 : f32 to vector<8x256xf32>
    %8 = arith.maximumf %6, %7 : vector<8x256xf32>
    %c0_7 = arith.constant 0 : index
    %c0_8 = arith.constant 0 : index
    %c0_9 = arith.constant 0 : index
    %9 = vector.load %arg5[%c0_7, %c0_8, %c0_9] : memref<1x8x256xf32, #tpu.memory_space<vmem>>, vector<1x8x256xf32>
    %10 = vector.shape_cast %9 : vector<1x8x256xf32> to vector<8x256xf32>
    %11 = vector.shape_cast %8 : vector<8x256xf32> to vector<1x8x256xf32>
    tpu.vector_store %arg5[%c0_7, %c0_8, %c0_9], %11 {strides = array<i32>} : memref<1x8x256xf32, #tpu.memory_space<vmem>>, vector<1x8x256xf32>,
    return
  }
  func.func @transform_0(%arg0: i32, %arg1: i32) -> (i32, i32, i32) {
    %c0_i32 = arith.constant 0 : i32
    %c0_i32_0 = arith.constant 0 : i32
    return %arg0, %c0_i32, %arg1 : i32, i32, i32
  }
  func.func @transform_1(%arg0: i32, %arg1: i32) -> (i32, i32) {
    %c0_i32 = arith.constant 0 : i32
    %c0_i32_0 = arith.constant 0 : i32
    %c0_i32_1 = arith.constant 0 : i32
    return %c0_i32, %c0_i32_0 : i32, i32
  }
  func.func @transform_2(%arg0: i32, %arg1: i32) -> (i32, i32) {
    %c0_i32 = arith.constant 0 : i32
    %c0_i32_0 = arith.constant 0 : i32
    %c0_i32_1 = arith.constant 0 : i32
    return %c0_i32, %c0_i32_0 : i32, i32
  }
  func.func @transform_3(%arg0: i32, %arg1: i32) -> (i32, i32, i32) {
    %c0_i32 = arith.constant 0 : i32
    %c0_i32_0 = arith.constant 0 : i32
    return %arg0, %c0_i32, %arg1 : i32, i32, i32
  }
}

</mosaic_0001>

<bundles_post_ra>
// kernel: tpu_custom_call.1
= control target key start
LH: loop header
LB: loop body
LE: loop exit
PB: predicated region body
PF: predicated region fallthrough
CT: control target
= control target key end

     0   :  { %8 = vsyncpa [#allocation3], 0  ;;  %s662_s0 = inlined_call_operand.vmem [shape: bf16[2,4,256], index: 0, kind: input, shape index: {}]   ;;  %s663_s1 = inlined_call_operand.vmem [shape: bf16[8,4], index: 1, kind: input, shape index: {}]   ;;  %s664_s2 = inlined_call_operand.vmem [shape: f32[8,1], index: 2, kind: input, shape index: {}]   ;;  %s665_s3 = inlined_call_operand.hbm [shape: f32[2,8,256], index: 3, kind: output, shape index: {}]  }
   0x1   :  { %10 = vsyncpa [#allocation3 + $0x1], 0  ;;  %s544_s12 = smov 0   ;;  %s546_s13 = smov 0  }
   0x2   :  { %s548_s14 = smov 0   ;;  %s550_s15 = smov 0  }
   0x3   :  { %s552_s16 = smov 0   ;;  %s554_s17 = smov 0  }
   0x4 LB: > { %s367_s18 = sadd.s32 4294967295, %s520_s17   ;;  %s368_s19 = sadd.s32 4294967294, %s520_s17   ;;  %s520_s17 = sphi %s554_s17, %s16_s17   ;;  %s516_s16 = sphi %s552_s16, %s672_s16   ;;  %s512_s15 = sphi %s550_s15, %s671_s15   ;;  %s508_s14 = sphi %s548_s14, %s670_s14   ;;  %s504_s13 = sphi %s546_s13, %s669_s13   ;;  %s500_s12 = sphi %s544_s12, %s668_s12  }
   0x5   : > { %s28_s20 = sadd.s32 1, %s516_s16  ;;  %s107_s21 = sadd.s32 1, %s508_s14 }
   0x6   : > { %p30_p0 = scmp.ge.s32.totalorder %s28_s20, 2  ;;  %p117_p1 = scmp.ne.s32.totalorder %s508_s14, %s504_s13 }
   0x7   : > { %p118_p2 = scmp.eq.s32.totalorder %s367_s18, 1  ;;  %p123_p3 = scmp.ne.s32.totalorder %s504_s13, %s500_s12 }
   0x8   : > { %s674_s20 = smov (%p30_p0, %s28_s20), 0  ;;  %p124_p5 = scmp.eq.s32.totalorder %s368_s19, 1 }
   0x9   : > { %p584_p4 = por %p118_p2, %p117_p1  ;;  %s102_s23 = ssub.s32 %s516_s16, %s674_s20 }
   0xa   : > { %p371_p6 = scmp.ge.s32.totalorder %s520_s17, 1  ;;  %p105_p7 = scmp.eq.s32.totalorder %s102_s23, 0 }
   0xb   : > { %p591_p8 = por %p124_p5, %p123_p3  ;;  %p161_p9 = scmp.lt.s32.totalorder %s520_s17, 3 }
   0xc   : > { %s597_s25 = scalar_select %p105_p7, %s508_s14, %s107_s21  }
   0xd   : > { %p162_p10 = pnand %p371_p6, %p161_p9 }
   0xe   : > { %p190_p11 = scmp.lt.s32.totalorder (!%p162_p10), %s512_s15, 1  ;;  %v522_v0 = vmov (!%p162_p10), 0   ;;  %v203_v1 = vld [vmem:[%s664_s2] sm:$0xff] (!%p162_p10)  ;;  %vm222_vm0 = vcmask (!%p162_p10), 1041408   ;;  %vm218_vm1 = vcmask (!%p162_p10), 31744   ;;  %s186_s8 = sand.u32 (!%p162_p10), 1, %s504_s13  }
   0xf   : > { %165 = sbr.rel (%p162_p10) target bundleno = 264 (0x108), region = 32  ;;  %261 = vmatprep.mubr.bf16.mxu0 (!%p162_p10), %v522_v0  ;;  %441 = vset.pattern.permute.xlu0 (!%p162_p10), %v522_v0  ;;  %v201_v5 = vld [vmem:[%s663_s1] sm:$0xf] (!%p162_p10)  ;;  %s372_s9 = sshll.u32 (!%p162_p10), %s186_s8, 4 }
  0x10   : > { %206 = vperm.xlu0 (!%p162_p10), %441, %v203_v1   ;;  %s384_s10 = sshll.u32 (!%p162_p10), %s512_s15, 8  ;;  %s188_s11 = scalar_lea.vmem (!%p162_p10), [#allocation2], %s372_s9 }
  0x11   : > { %s291_s18 = sshll.u32 (!%p162_p10), %s188_s11, 4  ;;  %s615_s23 = scalar_lea.hbm (!%p162_p10), %s665_s3, %s384_s10  ;;  %s617_s18 = int_to_ptr.vmem [resolvable:$true] %s291_s18 }
  0x12   : > { %s442_s26 = scalar_lea.vmem (!%p162_p10), %s617_s18, 256  ;;  %s523_s27 = smov (!%p162_p10), [#allocation2]  }
  0x13   : > { %p443_p12 = scmp.ne.s32.totalorder (!%p162_p10), %s617_s18, %s442_s26 }
  0x15   : > { %p444_p13 = pnand (!%p162_p10), %p443_p12, %p584_p4 }
  0x16   : > { %s191_s28 = scalar_select %p190_p11, %s512_s15, 1 }
  0x17   : > { %s275_s15 = scalar_lea.sflag [#allocation3], %s186_s8  ;;  %p445_p0 = pneg %p444_p13 }
  0x18   : > { %s383_s29 = sshll.u32 %s191_s28, 2  ;;  %s446_s28 = sshll.u32 %s523_s27, 4  ;;  %s447_s28 = int_to_ptr.vmem [resolvable:$false] %s446_s28 }
  0x19   : > { %s197_s5 = scalar_lea.vmem %s662_s0, %s383_s29  ;;  %s448_s29 = scalar_lea.vmem %s447_s28, 512 }
  0x1a   : > { %v375_v2 = vld.sshfl [vmem:[%s197_s5] sm:$0x33 pattern:$0x76325410]  ;;  %p449_p1 = scmp.lt.s32.totalorder %s617_s18, %s447_s28  ;;  %p450_p2 = scmp.lt.s32.totalorder %s448_s29, %s442_s26 }
  0x1b   : > { %v217_v3 = vcombine.high %v375_v2, %v375_v2  ;;  %v224_v4 = vsel %vm222_vm0, %v375_v2, 0 }
  0x1c   : > { %p451_p3 = por %p450_p2, %p449_p1 }
  0x1d   : > { %376 = vmatprep.subr.msk.bf16.mxu0 %vm222_vm0, %v217_v3 }
  0x1e   : > { %230 = vmatpush1.bf16.msra.mxu0 %v224_v4  ;;  %p452_p5 = pnand %p451_p3, %p445_p0 }
  0x21   : > { %377 = vmatmul.mubr.msk.bf16.vlgmr.msra.gmra.mrb[0].mxu0 %vm218_vm1, %v201_v5 }
  0x8f   : > { %v207_v6 = vpop.permute.xlu0 %206 }
  0xf4   : > { %v263_v7 = vpop.f32.mrb[0].mxu0 }
  0xf5   : > { %v264_v8 = vadd.f32 %v263_v7, %v207_v6  ;;  %v265_v9 = vpop.f32.mrb[1].mxu0 }
  0xf6   : > { %v266_v10 = vadd.f32 %v265_v9, %v207_v6  ;;  %v267_v11 = vpop.f32.mrb[2].mxu0 }
  0xf7   : > { %v270_v12 = vmax.f32 %v264_v8, 0.0  ;;  %v268_v13 = vpop.f32.mrb[3].mxu0 }
  0xf8   : > { %v271_v14 = vmax.f32 %v266_v10, 0.0 }
  0xf9   : > { %272 = vst [vmem:[%s188_s11] sm:$0xff] %v270_v12 }
  0xfa   : > { %273 = vst [vmem:[%s188_s11 + $0x8] sm:$0xff] %v271_v14 }
  0xfb   : > { %455 = shalt.err (!%p452_p5)
}
  0xfc   : > { %s456_s30 = scalar_lea.hbm %s615_s23, 256  ;;  %s460_s6 = scalar_lea.hbm %s665_s3, 512 }
  0xfd   : > { %p457_p6 = scmp.ne.s32.totalorder %s615_s23, %s456_s30  ;;  %p461_p10 = scmp.lt.u32.totalorder %s615_s23, %s665_s3 }
  0xfe   : > { %p462_p11 = scmp.lt.u32.totalorder %s460_s6, %s456_s30  ;;  %p464_p13 = scmp.lt.u32.totalorder %s456_s30, %s615_s23 }
  0xff   : > { %p458_p7 = pnand %p457_p6, %p584_p4 }
 0x100   : > { %p463_p12 = por %p462_p11, %p461_p10 }
 0x101   : > { %p459_p9 = pneg %p458_p7 }
 0x102   : > { %p465_p0 = por %p464_p13, %p463_p12 }
 0x104   : > { %p466_p1 = pnand %p465_p0, %p459_p9 }
 0x106   : > { %469 = shalt.err (!%p466_p1)
}
 0x107   : > { %385 = dma.vmem_to_hbm [thread:$0]  (%p584_p4), %s617_s18, 256, %s615_s23, %s275_s15  }
 0x108 PF: > { %p391_p2 = scmp.ge.s32.totalorder %s520_s17, 2  ;;  %s303_s9 = sand.u32 1, %s500_s12  }
 0x109   : > { %s304_s10 = scalar_lea.sflag [#allocation3], %s303_s9 }
 0x10a   : > { %p388_p3 = pnand %p391_p2, %p591_p8 }
 0x10c   : > { %495 = dma.done.wait (!%p388_p3), %s304_s10, 256  }
 0x10d   : > { %497 = vsyncadd (!%p388_p3), %s304_s10, 4294967040  ;;  %s16_s17 = sadd.s32 1, %s520_s17   ;;  %s668_s12 = smov %s504_s13 }
 0x10e   : > { %p13_p5 = scmp.ge.s32.totalorder %s16_s17, 4   ;;  %s669_s13 = smov %s508_s14 }
 0x10f   : > { %s670_s14 = smov %s597_s25  ;;  %s671_s15 = smov %s516_s16 }
 0x110   : > { %s672_s16 = smov %s674_s20  ;;  %15 = sbr.rel (!%p13_p5) target bundleno = 4 (0x4), region = 67 }
 0x117   :  { %309 = vsyncpa [#allocation3], 1 }
 0x118   :  { %311 = vsyncpa [#allocation3 + $0x1], 1 }

</bundles_post_ra>
